<compile_context>
chip_gen: v7x
topology: tpu7x:2x2x1
jax: 0.10.0
libtpu: 0.0.40
codegen_flags: <defaults>
</compile_context>

<pallas_src>
import jax
import jax.numpy as jnp
from jax.experimental import pallas as pl
from jax.experimental.pallas import tpu as pltpu

input_dim = 1
output_dim = 1

LANES = 128                 # batch is packed along the 128-lane axis
MAX_BLOCK_ROWS = 2048       # 2048 * 128 f32 = 1 MiB per buffer
SMALL_BATCH_ELEMS = 1024    # below this, skip Pallas entirely (launch-bound)


def _round_up(n, m):
    return ((n + m - 1) // m) * m


def linear_kernel(w_ref, b_ref, x_ref, o_ref):
    # w_ref: (1, 1) in SMEM, b_ref: (1,) in SMEM  -> scalar reads.
    # x_ref / o_ref: (block_rows, 128) VMEM tiles; batch lives on the lane axis.
    w = w_ref[0, 0]
    b = b_ref[0]
    o_ref[...] = x_ref[...] * w + b   # single VALU FMA per vreg; HBM-bound


def linear_forward(x, weight, bias):
    """x: (B, input_dim) f32, weight: (output_dim, input_dim), bias: (output_dim,)."""
    B = x.shape[0]

    # Small-batch (and B == 0) fast path: a pallas_call launch costs more than
    # the whole problem; XLA fuses this scalar FMA for free.
    if B * x.shape[1] <= SMALL_BATCH_ELEMS:
        return (x * weight[0, 0] + bias[0]).astype(x.dtype)

    itemsize = jnp.dtype(x.dtype).itemsize
    min_rows = 8 * max(1, 4 // itemsize)          # dtype-aware sublane minimum
    rows = pl.cdiv(B, LANES)                       # number of 128-lane rows

    # At least 2 grid steps so the "parallel" axis splits across both v7x TCs,
    # capped at 2048 rows (1 MiB f32) per block.
    target = pl.cdiv(rows, 2)
    block_rows = max(min_rows, min(MAX_BLOCK_ROWS, _round_up(target, min_rows)))
    grid = (pl.cdiv(rows, block_rows),)            # partial last block allowed

    # Lane-dense view of the batch. Free when B % 128 == 0; otherwise pad at
    # most 127 elements (never a whole block).
    padded_len = rows * LANES
    xf = x.reshape(-1)                             # (B,)   (input_dim == 1)
    if padded_len != B:
        xf = jnp.pad(xf, (0, padded_len - B))
    x2d = xf.reshape(rows, LANES)

    # Explicit VMEM budget: double-buffered input + output blocks plus slack,
    # clamped to stay within every generation's scoped-VMEM default.
    block_bytes = block_rows * LANES * itemsize
    vmem_limit = min(32 * 1024 * 1024, max(16 * 1024 * 1024, 6 * block_bytes))

    out2d = pl.pallas_call(
        linear_kernel,
        out_shape=jax.ShapeDtypeStruct((rows, LANES), x.dtype),
        grid=grid,
        in_specs=[
            # Scalar parameters: whole arrays in SMEM, no tiling, no VMEM DMA.
            pl.BlockSpec(memory_space=pltpu.MemorySpace.SMEM),   # weight (1, 1)
            pl.BlockSpec(memory_space=pltpu.MemorySpace.SMEM),   # bias   (1,)
            # Lane-dense batch tiles.
            pl.BlockSpec((block_rows, LANES), lambda i: (i, 0)),
        ],
        out_specs=pl.BlockSpec((block_rows, LANES), lambda i: (i, 0)),
        compiler_params=pltpu.CompilerParams(
            dimension_semantics=("parallel",),     # batch axis shards across TCs
            vmem_limit_bytes=vmem_limit,
        ),
    )(weight, bias, x2d)

    # Undo the lane-dense layout. Free (pure metadata) when B % 128 == 0.
    if padded_len != B:
        return out2d.reshape(-1)[:B].reshape(B, output_dim)
    return out2d.reshape(B, output_dim)


if __name__ == "__main__":
    key = jax.random.PRNGKey(0)
    kx1, kx2, kx3, kw, kb = jax.random.split(key, 5)

    # Same parameter shapes nn.Linear(1, 1) would have.
    weight = jax.random.uniform(kw, (output_dim, input_dim), jnp.float32,
                                minval=-1.0, maxval=1.0)
    bias = jax.random.uniform(kb, (output_dim,), jnp.float32,
                              minval=-1.0, maxval=1.0)

    def reference(xv):
        return xv @ weight.T + bias   # same math as torch.nn.Linear forward

    # 1) Pallas path: B multiple of 128 -> zero-copy wrapper, 2-step parallel grid.
    x1 = jax.random.normal(kx1, (2048, input_dim), jnp.float32)
    out1 = jax.block_until_ready(linear_forward(x1, weight, bias))
    assert out1.shape == (2048, output_dim)
    assert jnp.allclose(out1, reference(x1), atol=1e-5), "mismatch (aligned batch)"

    # 2) Pallas path: ragged B -> partial last grid block, <=127-element pad.
    x2 = jax.random.normal(kx2, (1300, input_dim), jnp.float32)
    out2 = jax.block_until_ready(linear_forward(x2, weight, bias))
    assert out2.shape == (1300, output_dim)
    assert jnp.allclose(out2, reference(x2), atol=1e-5), "mismatch (ragged batch)"

    # 3) Tiny batch -> plain-JAX fast path (no pallas launch overhead).
    x3 = jax.random.normal(kx3, (8, input_dim), jnp.float32)
    out3 = jax.block_until_ready(linear_forward(x3, weight, bias))
    assert out3.shape == (8, output_dim)
    assert jnp.allclose(out3, reference(x3), atol=1e-5), "mismatch (small batch)"

    print("KERNEL_OK")
</pallas_src>

<mosaic_0001>
module attributes {stable_mosaic.version = 11 : i64} {
  func.func @linear_kernel(%arg0: i32, %arg1: memref<1x1xf32, #tpu.memory_space<smem>>, %arg2: memref<1xf32, #tpu.memory_space<smem>>, %arg3: memref<8x128xf32, #tpu.memory_space<vmem>>, %arg4: memref<8x128xf32, #tpu.memory_space<vmem>>) attributes {dimension_semantics = [#tpu.dimension_semantics<parallel>], iteration_bounds = array<i64: 2>, scalar_prefetch = 0 : i64, scratch_operands = 0 : i64, tpu.core_type = #tpu.core_type<tc>, window_params = [{transform_indices = @transform_0, window_bounds = array<i64: 1, 1>}, {transform_indices = @transform_1, window_bounds = array<i64: 1>}, {transform_indices = @transform_2, window_bounds = array<i64: 8, 128>}, {transform_indices = @transform_3, window_bounds = array<i64: 8, 128>}]} {
    %c0 = arith.constant 0 : index
    %c0_0 = arith.constant 0 : index
    %0 = memref.load %arg1[%c0, %c0_0] : memref<1x1xf32, #tpu.memory_space<smem>>
    %c0_1 = arith.constant 0 : index
    %1 = memref.load %arg2[%c0_1] : memref<1xf32, #tpu.memory_space<smem>>
    %c0_2 = arith.constant 0 : index
    %c0_3 = arith.constant 0 : index
    %2 = vector.load %arg3[%c0_2, %c0_3] : memref<8x128xf32, #tpu.memory_space<vmem>>, vector<8x128xf32>
    %3 = vector.broadcast %0 : f32 to vector<8x128xf32>
    %4 = arith.mulf %2, %3 : vector<8x128xf32>
    %5 = vector.broadcast %1 : f32 to vector<8x128xf32>
    %6 = arith.addf %4, %5 : vector<8x128xf32>
    %c0_4 = arith.constant 0 : index
    %c0_5 = arith.constant 0 : index
    %7 = vector.load %arg4[%c0_4, %c0_5] : memref<8x128xf32, #tpu.memory_space<vmem>>, vector<8x128xf32>
    tpu.vector_store %arg4[%c0_4, %c0_5], %6 {strides = array<i32>} : memref<8x128xf32, #tpu.memory_space<vmem>>, vector<8x128xf32>,
    return
  }
  func.func @transform_0(%arg0: i32) -> (i32, i32) {
    %c0_i32 = arith.constant 0 : i32
    %c0_i32_0 = arith.constant 0 : i32
    %c0_i32_1 = arith.constant 0 : i32
    return %c0_i32, %c0_i32_0 : i32, i32
  }
  func.func @transform_1(%arg0: i32) -> i32 {
    %c0_i32 = arith.constant 0 : i32
    %c0_i32_0 = arith.constant 0 : i32
    return %c0_i32 : i32
  }
  func.func @transform_2(%arg0: i32) -> (i32, i32) {
    %c0_i32 = arith.constant 0 : i32
    %c0_i32_0 = arith.constant 0 : i32
    return %arg0, %c0_i32 : i32, i32
  }
  func.func @transform_3(%arg0: i32) -> (i32, i32) {
    %c0_i32 = arith.constant 0 : i32
    %c0_i32_0 = arith.constant 0 : i32
    return %arg0, %c0_i32 : i32, i32
  }
}

</mosaic_0001>

<bundles_post_ra>
// kernel: tpu_custom_call.1
= control target key start
LH: loop header
LB: loop body
LE: loop exit
PB: predicated region body
PF: predicated region fallthrough
CT: control target
= control target key end

     0   :  { %s625_s0 = inlined_call_operand.<no memory space> [shape: f32[1,1], index: 0, kind: input, shape index: {}]   ;;  %s626_s1 = inlined_call_operand.<no memory space> [shape: f32[1], index: 1, kind: input, shape index: {}]   ;;  %s627_s2 = inlined_call_operand.hbm [shape: f32[16,128], index: 2, kind: input, shape index: {}]   ;;  %s628_s3 = inlined_call_operand.hbm [shape: f32[16,128], index: 3, kind: output, shape index: {}]  }
   0x1   :  { %8 = sst [smem:[#allocation2]] %s625_s0 }
   0x2   :  { %9 = sst [smem:[#allocation3]] %s626_s1 }
   0x3   :  { %10 = vsyncpa [#allocation5], 0 }
   0x4   :  { %12 = vsyncpa [#allocation5 + $0x1], 0 }
   0x5   :  { %13 = vsyncpa [#allocation6], 0 }
   0x6   :  { %15 = vsyncpa [#allocation6 + $0x1], 0  ;;  %s464_s16 = smov 0   ;;  %s466_s17 = smov 0  }
   0x7   :  { %s468_s18 = smov 0   ;;  %s470_s19 = smov 0  }
   0x8 LB: > { %s485_s0 = sadd.s32 4294967295, %s434_s19   ;;  %s280_s1 = sadd.s32 4294967294, %s434_s19   ;;  %s434_s19 = sphi %s470_s19, %s643_s19   ;;  %s430_s18 = sphi %s468_s18, %s642_s18   ;;  %s426_s17 = sphi %s466_s17, %s641_s17   ;;  %s422_s16 = sphi %s464_s16, %s640_s16  }
   0x9   : > { %s489_s20 = sadd.s32 1, %s434_s19   ;;  %s70_s21 = sadd.s32 1, %s430_s18 }
   0xa   : > { %s67_s22 = ssub.s32 %s434_s19, %s489_s20  ;;  %p77_p0 = scmp.ne.s32.totalorder %s430_s18, %s426_s17 }
   0xb   : > { %p68_p1 = scmp.eq.s32.totalorder %s67_s22, 0  ;;  %p78_p2 = scmp.eq.s32.totalorder %s434_s19, 0 }
   0xc   : > { %p83_p3 = scmp.ne.s32.totalorder %s426_s17, %s422_s16  ;;  %p84_p4 = scmp.eq.s32.totalorder %s485_s0, 0 }
   0xd   : > { %s501_s23 = scalar_select %p68_p1, %s430_s18, %s70_s21  }
   0xe   : > { %p503_p5 = por %p78_p2, %p77_p0  ;;  %p507_p6 = por %p84_p4, %p83_p3 }
   0xf   : > { %p107_p7 = scmp.eq.s32.totalorder %s485_s0, 1  ;;  %p113_p8 = scmp.eq.s32.totalorder %s280_s1, 1 }
  0x10   : > { %p304_p10 = scmp.lt.s32.totalorder %s434_s19, 2  ;;  %s139_s28 = sand.u32 1, %s430_s18  }
  0x11   : > { %p514_p11 = por %p107_p7, %p77_p0  ;;  %p518_p12 = por %p113_p8, %p83_p3 }
  0x12   : > { %s284_s29 = sshll.u32 %s434_s19, 7  ;;  %s283_s30 = sshll.u32 %s139_s28, 3 }
  0x13   : > { %s632_s26 = scalar_select %p514_p11, 1, 0 }
  0x14   : > { %s633_s27 = scalar_select %p518_p12, 1, 0 }
  0x15   : > { %s527_s6 = scalar_lea.hbm %s627_s2, %s284_s29  ;;  %s143_s7 = scalar_lea.vmem [#allocation4], %s283_s30 }
  0x16   : > { %s150_s8 = sshll.u32 %s143_s7, 4  ;;  %p531_p13 = pnand %p304_p10, %p503_p5  ;;  %s535_s8 = int_to_ptr.vmem [resolvable:$true] %s150_s8 }
  0x17   : > { %s140_s10 = scalar_lea.sflag [#allocation5], %s139_s28  ;;  %s338_s11 = scalar_lea.hbm %s527_s6, 128 }
  0x18   : > { %p339_p2 = scmp.ne.s32.totalorder %s527_s6, %s338_s11  ;;  %p340_p3 = pneg %p531_p13 }
  0x19   : > { %s343_s14 = scalar_lea.hbm %s627_s2, 256  ;;  %p344_p5 = scmp.lt.u32.totalorder %s527_s6, %s627_s2 }
  0x1a   : > { %p341_p4 = pnand %p340_p3, %p339_p2  ;;  %p345_p8 = scmp.lt.u32.totalorder %s343_s14, %s338_s11 }
  0x1b   : > { %p347_p9 = scmp.lt.u32.totalorder %s338_s11, %s527_s6 }
  0x1c   : > { %p342_p7 = pneg %p341_p4  ;;  %p346_p10 = por %p345_p8, %p344_p5 }
  0x1e   : > { %p348_p0 = por %p347_p9, %p346_p10 }
  0x20   : > { %p349_p1 = pnand %p348_p0, %p342_p7 }
  0x22   : > { %352 = shalt.err (!%p349_p1)
}
  0x23   : > { %s353_s21 = scalar_lea.vmem %s535_s8, 128  ;;  %s436_s22 = smov [#allocation4]  }
  0x24   : > { %p354_p2 = scmp.ne.s32.totalorder %s535_s8, %s353_s21  ;;  %s358_s24 = sshll.u32 %s436_s22, 4  ;;  %s359_s24 = int_to_ptr.vmem [resolvable:$false] %s358_s24 }
  0x25   : > { %s360_s28 = scalar_lea.vmem %s359_s24, 256  ;;  %p361_p11 = scmp.lt.s32.totalorder %s535_s8, %s359_s24 }
  0x26   : > { %p356_p4 = pnand %p354_p2, %p340_p3  ;;  %p362_p5 = scmp.lt.s32.totalorder %s360_s28, %s353_s21 }
  0x28   : > { %p357_p12 = pneg %p356_p4  ;;  %p363_p8 = por %p362_p5, %p361_p11 }
  0x2a   : > { %p364_p9 = pnand %p363_p8, %p357_p12 }
  0x2c   : > { %367 = shalt.err (!%p364_p9)
}
  0x2d   : > { %299 = dma.hbm_to_vmem [thread:$0]  (!%p531_p13), %s527_s6, 128, %s535_s8, %s140_s10  }
  0x2e   : > { %p635_p0 = scmp.lt.s32.totalorder %s434_s19, 3  ;;  %p636_p1 = scmp.ge.s32.totalorder %s434_s19, 1 }
  0x30   : > { %p156_p3 = pnand %p636_p1, %p635_p0 }
  0x31   : > { %s569_s29 = sand.u32 (!%p156_p3), 1, %s426_s17  }
  0x32   : > { %159 = sbr.rel (%p156_p3) target bundleno = 85 (0x55), region = 32  ;;  %s286_s30 = sshll.u32 (!%p156_p3), %s569_s29, 3 }
  0x33   : > { %s162_s4 = scalar_lea.sflag (!%p156_p3), [#allocation5], %s569_s29  ;;  %s165_s5 = scalar_lea.vmem (!%p156_p3), [#allocation4], %s286_s30 }
  0x39   : > { %413 = dma.done.wait (%p507_p6), %s162_s4, 128  }
  0x3a   : > { %415 = vsyncadd (%p507_p6), %s162_s4, 4294967168  ;;  %s188_s6 = sld [smem:[#allocation2]]  ;;  %v190_v0 = vld [vmem:[%s165_s5] sm:$0xff]  ;;  %s187_s8 = scalar_lea.vmem [#allocation7], %s286_s30 }
  0x3b   : > { %s189_s7 = sld [smem:[#allocation3]]  ;;  %s210_s9 = sshll.u32 %s187_s8, 4  ;;  %s578_s9 = int_to_ptr.vmem [resolvable:$true] %s210_s9 }
  0x3c   : > { %s289_s10 = sshll.u32 %s485_s0, 7  ;;  %s197_s13 = scalar_lea.sflag [#allocation6], %s569_s29 }
  0x3d   : > { %s583_s25 = scalar_lea.hbm %s628_s3, %s289_s10  ;;  %s368_s14 = scalar_lea.vmem %s578_s9, 128 }
  0x3e   : > { %p369_p6 = scmp.ne.s32.totalorder %s578_s9, %s368_s14  ;;  %p637_p11 = scmp.ne.s32.totalorder %s632_s26, 0 }
  0x3f   : > { %s437_s0 = smov [#allocation7]  }
  0x40   : > { %v191_v1 = vstv %s188_s6  ;;  %p370_p12 = pnand %p369_p6, %p637_p11  ;;  %s372_s15 = sshll.u32 %s437_s0, 4  ;;  %s373_s15 = int_to_ptr.vmem [resolvable:$false] %s372_s15 }
  0x41   : > { %v193_v2 = vstv %s189_s7  ;;  %v192_v3 = vmul.f32 %v191_v1, %v190_v0  ;;  %s374_s1 = scalar_lea.vmem %s373_s15, 256  ;;  %p375_p7 = scmp.lt.s32.totalorder %s578_s9, %s373_s15 }
  0x42   : > { %p371_p13 = pneg %p370_p12  ;;  %p376_p10 = scmp.lt.s32.totalorder %s374_s1, %s368_s14 }
  0x43   : > { %v194_v4 = vadd.f32 %v193_v2, %v192_v3 }
  0x44   : > { %p377_p2 = por %p376_p10, %p375_p7 }
  0x45   : > { %195 = vst [vmem:[%s187_s8] sm:$0xff] %v194_v4 }
  0x46   : > { %p378_p4 = pnand %p377_p2, %p371_p13 }
  0x48   : > { %381 = shalt.err (!%p378_p4)
}
  0x49   : > { %s382_s21 = scalar_lea.hbm %s583_s25, 128  ;;  %s386_s28 = scalar_lea.hbm %s628_s3, 256 }
  0x4a   : > { %p383_p5 = scmp.ne.s32.totalorder %s583_s25, %s382_s21  ;;  %p387_p0 = scmp.lt.u32.totalorder %s583_s25, %s628_s3 }
  0x4b   : > { %p388_p1 = scmp.lt.u32.totalorder %s386_s28, %s382_s21  ;;  %p390_p6 = scmp.lt.u32.totalorder %s382_s21, %s583_s25 }
  0x4c   : > { %p384_p8 = pnand %p383_p5, %p637_p11 }
  0x4d   : > { %p389_p3 = por %p388_p1, %p387_p0 }
  0x4e   : > { %p385_p9 = pneg %p384_p8 }
  0x4f   : > { %p391_p12 = por %p390_p6, %p389_p3 }
  0x51   : > { %p392_p13 = pnand %p391_p12, %p385_p9 }
  0x53   : > { %395 = shalt.err (!%p392_p13)
}
  0x54   : > { %294 = dma.vmem_to_hbm [thread:$0]  (%p637_p11), %s578_s9, 128, %s583_s25, %s197_s13  }
  0x55 PF: > { %s222_s4 = sand.u32 1, %s422_s16   ;;  %p638_p7 = scmp.ne.s32.totalorder %s633_s27, 0 }
  0x56   : > { %p639_p10 = scmp.ge.s32.totalorder %s434_s19, 2  ;;  %s223_s5 = scalar_lea.sflag [#allocation6], %s222_s4 }
  0x58   : > { %p301_p2 = pnand %p639_p10, %p638_p7 }
  0x5a   : > { %417 = dma.done.wait (!%p301_p2), %s223_s5, 128  }
  0x5b   : > { %419 = vsyncadd (!%p301_p2), %s223_s5, 4294967168  ;;  %p18_p4 = scmp.ge.s32.totalorder %s489_s20, 4   ;;  %s640_s16 = smov %s426_s17 }
  0x5c   : > { %s641_s17 = smov %s430_s18  ;;  %s642_s18 = smov %s501_s23 }
  0x5d   : > { %s643_s19 = smov %s489_s20  ;;  %20 = sbr.rel (!%p18_p4) target bundleno = 8 (0x8), region = 77 }
  0x64   :  { %228 = vsyncpa [#allocation5], 1 }
  0x65   :  { %230 = vsyncpa [#allocation5 + $0x1], 1 }
  0x66   :  { %231 = vsyncpa [#allocation6], 1 }
  0x67   :  { %233 = vsyncpa [#allocation6 + $0x1], 1 }

</bundles_post_ra>
